<compile_context>
chip_gen: v7x
topology: tpu7x:2x2x1
jax: 0.10.0
libtpu: 0.0.40
codegen_flags: <defaults>
</compile_context>

<pallas_src>
import jax
import jax.numpy as jnp
from jax.experimental import pallas as pl
from jax.experimental.pallas import tpu as pltpu

LANE = 128          # vreg lane width (output slab width)
TILE_ALIGN = 16     # bf16-friendly sublane alignment for batch tiles


def _round_up(n, m):
    return ((n + m - 1) // m) * m


def categorical_policy_kernel(x_ref, g_ref, a_ref,
                              w1_ref, b1_ref, w2_ref, b2_ref, w3_ref, b3_ref,
                              out_ref):
    # ---- MLP hot path: bf16 MXU matmuls with f32 accumulate; tanh in f32 (VPU/EUP) ----
    h = jnp.tanh(jnp.dot(x_ref[...], w1_ref[...],
                         preferred_element_type=jnp.float32) + b1_ref[...])
    h = jnp.tanh(jnp.dot(h.astype(jnp.bfloat16), w2_ref[...],
                         preferred_element_type=jnp.float32) + b2_ref[...])
    logits = jnp.dot(h.astype(jnp.bfloat16), w3_ref[...],
                     preferred_element_type=jnp.float32) + b3_ref[...]

    tb, adim = logits.shape

    # ---- log-sum-exp over the (unpadded) action lanes ----
    m = jnp.max(logits, axis=-1, keepdims=True)
    lse = m + jnp.log(jnp.sum(jnp.exp(logits - m), axis=-1, keepdims=True))

    # ---- Gumbel-max sampling (noise streamed from HBM; distributionally == Categorical.sample) ----
    z = logits + g_ref[...]
    zmax = jnp.max(z, axis=-1, keepdims=True)
    lane = jax.lax.broadcasted_iota(jnp.int32, (tb, adim), 1)
    pi = jnp.min(jnp.where(z == zmax, lane, adim), axis=-1, keepdims=True)   # (TB,1) int32

    # ---- log-probs: gather the selected logits and reuse lse (no full log-softmax table) ----
    logit_pi = jnp.sum(jnp.where(lane == pi, logits, 0.0), axis=-1, keepdims=True)
    logit_a = jnp.sum(jnp.where(lane == a_ref[...], logits, 0.0), axis=-1, keepdims=True)
    logp_pi = logit_pi - lse
    logp_a = logit_a - lse

    # ---- pack into one lane-dense f32 slab: lane0=logp(a), lane1=logp(pi), lane2=float(pi) ----
    # pi stored as an exact small-int float (avoids denormal-flush hazard of a raw bitcast).
    out_lane = jax.lax.broadcasted_iota(jnp.int32, out_ref.shape, 1)
    out_ref[...] = jnp.where(out_lane == 0, logp_a,
                   jnp.where(out_lane == 1, logp_pi,
                   jnp.where(out_lane == 2, pi.astype(jnp.float32), 0.0)))


def init_params(key, input_dim, hidden_dims, action_dim):
    """nn.Linear-like init (uniform +-1/sqrt(fan_in)); biases zeroed per MLP.__init__."""
    dims = [input_dim] + list(hidden_dims) + [action_dim]
    params = []
    for d_in, d_out in zip(dims[:-1], dims[1:]):
        key, sub = jax.random.split(key)
        bound = 1.0 / (d_in ** 0.5)
        w = jax.random.uniform(sub, (d_in, d_out), jnp.float32, -bound, bound)
        b = jnp.zeros((d_out,), jnp.float32)
        params += [w, b]
    return tuple(params)


def prepare_params(params):
    """Weights -> bf16 for the MXU; biases -> (1, d) f32 rows.  No padding needed: every
    BlockSpec uses full-extent feature dims."""
    w1, b1, w2, b2, w3, b3 = params
    return (w1.astype(jnp.bfloat16), b1.reshape(1, -1).astype(jnp.float32),
            w2.astype(jnp.bfloat16), b2.reshape(1, -1).astype(jnp.float32),
            w3.astype(jnp.bfloat16), b3.reshape(1, -1).astype(jnp.float32))


def categorical_policy(x, prepared_params, a, key, *, tile_b=2048):
    """Returns (pi, logp, logp_pi) like CategoricalPolicy.forward(x, a)."""
    B, d_in = x.shape
    w1, b1, w2, b2, w3, b3 = prepared_params
    h1 = w1.shape[1]
    h2 = w2.shape[1]
    action_dim = w3.shape[1]

    # Big tiles amortize per-grid-step overhead; force >= 2 steps so the single "parallel"
    # axis can shard across both TensorCores on v7x.
    num_tiles = max(2, pl.cdiv(B, tile_b))
    TB = _round_up(pl.cdiv(B, num_tiles), TILE_ALIGN)
    B_pad = num_tiles * TB

    # Batch-pad only, in the streamed dtypes (no f32 feature-pad round trip through HBM).
    x_p = jnp.pad(x.astype(jnp.bfloat16), ((0, B_pad - B), (0, 0)))
    g = jax.random.gumbel(key, (B_pad, action_dim), jnp.float32)
    if a is None:
        a_in = jnp.zeros((B,), jnp.int32)
    else:
        a_in = a.astype(jnp.int32)
    a_p = jnp.pad(a_in, (0, B_pad - B)).reshape(B_pad, 1)

    grid_spec = pltpu.PrefetchScalarGridSpec(
        num_scalar_prefetch=0,
        grid=(num_tiles,),
        in_specs=[
            pl.BlockSpec((TB, d_in), lambda i: (i, 0)),        # x: streamed bf16 batch tile
            pl.BlockSpec((TB, action_dim), lambda i: (i, 0)),  # Gumbel noise (tiny: A lanes)
            pl.BlockSpec((TB, 1), lambda i: (i, 0)),           # actions
            pl.BlockSpec(w1.shape, lambda i: (0, 0)),          # weights/biases stay VMEM-resident
            pl.BlockSpec(b1.shape, lambda i: (0, 0)),
            pl.BlockSpec(w2.shape, lambda i: (0, 0)),
            pl.BlockSpec(b2.shape, lambda i: (0, 0)),
            pl.BlockSpec(w3.shape, lambda i: (0, 0)),
            pl.BlockSpec(b3.shape, lambda i: (0, 0)),
        ],
        out_specs=pl.BlockSpec((TB, LANE), lambda i: (i, 0)),  # packed lane-dense slab
    )

    param_bytes = sum(int(p.size) * p.dtype.itemsize for p in prepared_params)
    cost = pl.CostEstimate(
        flops=2 * B_pad * (d_in * h1 + h1 * h2 + h2 * action_dim),
        transcendentals=B_pad * (h1 + h2 + action_dim + 1),
        bytes_accessed=int(x_p.size) * 2 + int(g.size) * 4 + int(a_p.size) * 4
                       + B_pad * LANE * 4 + param_bytes,
    )

    packed = pl.pallas_call(
        categorical_policy_kernel,
        out_shape=jax.ShapeDtypeStruct((B_pad, LANE), jnp.float32),
        grid_spec=grid_spec,
        compiler_params=pltpu.CompilerParams(
            dimension_semantics=("parallel",),
        ),
        cost_estimate=cost,
    )(x_p, g, a_p, w1, b1, w2, b2, w3, b3)

    logp = packed[:B, 0] if a is not None else None
    logp_pi = packed[:B, 1]
    pi = packed[:B, 2].astype(jnp.int32)
    return pi, logp, logp_pi


if __name__ == "__main__":
    B, INPUT_DIM, HIDDEN, ACTION_DIM = 8, 32, (64, 64), 8

    key = jax.random.PRNGKey(0)
    k_params, k_x, k_a, k_sample = jax.random.split(key, 4)

    raw_params = init_params(k_params, INPUT_DIM, HIDDEN, ACTION_DIM)
    params = prepare_params(raw_params)

    x = jax.random.normal(k_x, (B, INPUT_DIM), jnp.float32)
    a = jax.random.randint(k_a, (B,), 0, ACTION_DIM, jnp.int32)

    pi, logp, logp_pi = categorical_policy(x, params, a, k_sample)
    jax.block_until_ready((pi, logp, logp_pi))

    # Pure-JAX reference of the log-prob math using the same bf16 weights.
    # Sampling uses wrapper-generated Gumbel noise, so we check pi validity + log-prob consistency.
    w1, b1, w2, b2, w3, b3 = params
    h = jnp.tanh(jnp.dot(x.astype(jnp.bfloat16), w1, preferred_element_type=jnp.float32) + b1)
    h = jnp.tanh(jnp.dot(h.astype(jnp.bfloat16), w2, preferred_element_type=jnp.float32) + b2)
    logits = jnp.dot(h.astype(jnp.bfloat16), w3, preferred_element_type=jnp.float32) + b3
    logp_all = jax.nn.log_softmax(logits, axis=-1)

    assert pi.shape == (B,) and logp.shape == (B,) and logp_pi.shape == (B,)
    assert bool(jnp.all((pi >= 0) & (pi < ACTION_DIM)))
    assert jnp.allclose(logp, jnp.take_along_axis(logp_all, a[:, None], 1)[:, 0],
                        atol=1e-3, rtol=1e-3)
    assert jnp.allclose(logp_pi, jnp.take_along_axis(logp_all, pi[:, None], 1)[:, 0],
                        atol=1e-3, rtol=1e-3)

    print("KERNEL_OK")
</pallas_src>

<mosaic_0001>
module attributes {stable_mosaic.version = 11 : i64} {
  func.func @categorical_policy_kernel(%arg0: i32, %arg1: memref<16x32xbf16, #tpu.memory_space<vmem>>, %arg2: memref<16x8xf32, #tpu.memory_space<vmem>>, %arg3: memref<16x1xi32, #tpu.memory_space<vmem>>, %arg4: memref<32x64xbf16, #tpu.memory_space<vmem>>, %arg5: memref<1x64xf32, #tpu.memory_space<vmem>>, %arg6: memref<64x64xbf16, #tpu.memory_space<vmem>>, %arg7: memref<1x64xf32, #tpu.memory_space<vmem>>, %arg8: memref<64x8xbf16, #tpu.memory_space<vmem>>, %arg9: memref<1x8xf32, #tpu.memory_space<vmem>>, %arg10: memref<16x128xf32, #tpu.memory_space<vmem>>) attributes {dimension_semantics = [#tpu.dimension_semantics<parallel>], iteration_bounds = array<i64: 2>, scalar_prefetch = 0 : i64, scratch_operands = 0 : i64, tpu.core_type = #tpu.core_type<tc>, window_params = [{transform_indices = @transform_0, window_bounds = array<i64: 16, 32>}, {transform_indices = @transform_1, window_bounds = array<i64: 16, 8>}, {transform_indices = @transform_2, window_bounds = array<i64: 16, 1>}, {pipeline_mode = #tpu.pipeline_mode<synchronous>, transform_indices = @transform_3, window_bounds = array<i64: 32, 64>}, {pipeline_mode = #tpu.pipeline_mode<synchronous>, transform_indices = @transform_4, window_bounds = array<i64: 1, 64>}, {pipeline_mode = #tpu.pipeline_mode<synchronous>, transform_indices = @transform_5, window_bounds = array<i64: 64, 64>}, {pipeline_mode = #tpu.pipeline_mode<synchronous>, transform_indices = @transform_6, window_bounds = array<i64: 1, 64>}, {pipeline_mode = #tpu.pipeline_mode<synchronous>, transform_indices = @transform_7, window_bounds = array<i64: 64, 8>}, {pipeline_mode = #tpu.pipeline_mode<synchronous>, transform_indices = @transform_8, window_bounds = array<i64: 1, 8>}, {transform_indices = @transform_9, window_bounds = array<i64: 16, 128>}]} {
    %c0 = arith.constant 0 : index
    %c0_0 = arith.constant 0 : index
    %0 = vector.load %arg1[%c0, %c0_0] : memref<16x32xbf16, #tpu.memory_space<vmem>>, vector<16x32xbf16>
    %c0_1 = arith.constant 0 : index
    %c0_2 = arith.constant 0 : index
    %1 = vector.load %arg4[%c0_1, %c0_2] : memref<32x64xbf16, #tpu.memory_space<vmem>>, vector<32x64xbf16>
    %cst = arith.constant dense<0.000000e+00> : vector<16x64xf32>
    %2 = tpu.matmul %0, %1, %cst {dimension_numbers = #tpu.dot_dimension_numbers<[1], [0], [0], [1], [0, 0, 1, 1], [], []>} : vector<16x32xbf16>, vector<32x64xbf16>, vector<16x64xf32> -> vector<16x64xf32>
    %c0_3 = arith.constant 0 : index
    %c0_4 = arith.constant 0 : index
    %3 = vector.load %arg5[%c0_3, %c0_4] : memref<1x64xf32, #tpu.memory_space<vmem>>, vector<1x64xf32>
    %4 = vector.broadcast %3 : vector<1x64xf32> to vector<16x64xf32>
    %5 = arith.addf %2, %4 : vector<16x64xf32>
    %6 = math.tanh %5 : vector<16x64xf32>
    %7 = arith.truncf %6 : vector<16x64xf32> to vector<16x64xbf16>
    %c0_5 = arith.constant 0 : index
    %c0_6 = arith.constant 0 : index
    %8 = vector.load %arg6[%c0_5, %c0_6] : memref<64x64xbf16, #tpu.memory_space<vmem>>, vector<64x64xbf16>
    %cst_7 = arith.constant dense<0.000000e+00> : vector<16x64xf32>
    %9 = tpu.matmul %7, %8, %cst_7 {dimension_numbers = #tpu.dot_dimension_numbers<[1], [0], [0], [1], [0, 0, 1, 1], [], []>} : vector<16x64xbf16>, vector<64x64xbf16>, vector<16x64xf32> -> vector<16x64xf32>
    %c0_8 = arith.constant 0 : index
    %c0_9 = arith.constant 0 : index
    %10 = vector.load %arg7[%c0_8, %c0_9] : memref<1x64xf32, #tpu.memory_space<vmem>>, vector<1x64xf32>
    %11 = vector.broadcast %10 : vector<1x64xf32> to vector<16x64xf32>
    %12 = arith.addf %9, %11 : vector<16x64xf32>
    %13 = math.tanh %12 : vector<16x64xf32>
    %14 = arith.truncf %13 : vector<16x64xf32> to vector<16x64xbf16>
    %c0_10 = arith.constant 0 : index
    %c0_11 = arith.constant 0 : index
    %15 = vector.load %arg8[%c0_10, %c0_11] : memref<64x8xbf16, #tpu.memory_space<vmem>>, vector<64x8xbf16>
    %cst_12 = arith.constant dense<0.000000e+00> : vector<16x8xf32>
    %16 = tpu.matmul %14, %15, %cst_12 {dimension_numbers = #tpu.dot_dimension_numbers<[1], [0], [0], [1], [0, 0, 1, 1], [], []>} : vector<16x64xbf16>, vector<64x8xbf16>, vector<16x8xf32> -> vector<16x8xf32>
    %c0_13 = arith.constant 0 : index
    %c0_14 = arith.constant 0 : index
    %17 = vector.load %arg9[%c0_13, %c0_14] : memref<1x8xf32, #tpu.memory_space<vmem>>, vector<1x8xf32>
    %18 = vector.broadcast %17 : vector<1x8xf32> to vector<16x8xf32>
    %19 = arith.addf %16, %18 : vector<16x8xf32>
    %cst_15 = arith.constant dense<0xFF800000> : vector<16xf32>
    %20 = vector.multi_reduction <maximumf>, %19, %cst_15 [1] : vector<16x8xf32> to vector<16xf32>
    %21 = vector.shape_cast %20 : vector<16xf32> to vector<16x1xf32>
    %22 = vector.broadcast %21 : vector<16x1xf32> to vector<16x8xf32>
    %23 = arith.subf %19, %22 : vector<16x8xf32>
    %24 = math.exp %23 : vector<16x8xf32>
    %cst_16 = arith.constant dense<0.000000e+00> : vector<16xf32>
    %25 = vector.multi_reduction <add>, %24, %cst_16 [1] : vector<16x8xf32> to vector<16xf32>
    %26 = vector.shape_cast %25 : vector<16xf32> to vector<16x1xf32>
    %27 = math.log %26 : vector<16x1xf32>
    %28 = arith.addf %21, %27 : vector<16x1xf32>
    %c0_17 = arith.constant 0 : index
    %c0_18 = arith.constant 0 : index
    %29 = vector.load %arg2[%c0_17, %c0_18] : memref<16x8xf32, #tpu.memory_space<vmem>>, vector<16x8xf32>
    %30 = arith.addf %19, %29 : vector<16x8xf32>
    %cst_19 = arith.constant dense<0xFF800000> : vector<16xf32>
    %31 = vector.multi_reduction <maximumf>, %30, %cst_19 [1] : vector<16x8xf32> to vector<16xf32>
    %32 = vector.shape_cast %31 : vector<16xf32> to vector<16x1xf32>
    %33 = tpu.iota {dimensions = array<i32: 1>} : vector<16x8xi32>
    %34 = vector.broadcast %32 : vector<16x1xf32> to vector<16x8xf32>
    %35 = arith.cmpf oeq, %30, %34 : vector<16x8xf32>
    %c8_i32 = arith.constant 8 : i32
    %36 = vector.broadcast %c8_i32 : i32 to vector<16x8xi32>
    %37 = arith.select %35, %33, %36 : vector<16x8xi1>, vector<16x8xi32>
    %cst_20 = arith.constant dense<2147483647> : vector<16xi32>
    %38 = vector.multi_reduction <minsi>, %37, %cst_20 [1] : vector<16x8xi32> to vector<16xi32>
    %39 = vector.shape_cast %38 : vector<16xi32> to vector<16x1xi32>
    %40 = vector.broadcast %39 : vector<16x1xi32> to vector<16x8xi32>
    %41 = arith.cmpi eq, %33, %40 : vector<16x8xi32>
    %cst_21 = arith.constant 0.000000e+00 : f32
    %42 = vector.broadcast %cst_21 : f32 to vector<16x8xf32>
    %43 = arith.select %41, %19, %42 : vector<16x8xi1>, vector<16x8xf32>
    %cst_22 = arith.constant dense<0.000000e+00> : vector<16xf32>
    %44 = vector.multi_reduction <add>, %43, %cst_22 [1] : vector<16x8xf32> to vector<16xf32>
    %45 = vector.shape_cast %44 : vector<16xf32> to vector<16x1xf32>
    %c0_23 = arith.constant 0 : index
    %c0_24 = arith.constant 0 : index
    %46 = vector.load %arg3[%c0_23, %c0_24] : memref<16x1xi32, #tpu.memory_space<vmem>>, vector<16x1xi32>
    %47 = vector.broadcast %46 : vector<16x1xi32> to vector<16x8xi32>
    %48 = arith.cmpi eq, %33, %47 : vector<16x8xi32>
    %cst_25 = arith.constant 0.000000e+00 : f32
    %49 = vector.broadcast %cst_25 : f32 to vector<16x8xf32>
    %50 = arith.select %48, %19, %49 : vector<16x8xi1>, vector<16x8xf32>
    %cst_26 = arith.constant dense<0.000000e+00> : vector<16xf32>
    %51 = vector.multi_reduction <add>, %50, %cst_26 [1] : vector<16x8xf32> to vector<16xf32>
    %52 = vector.shape_cast %51 : vector<16xf32> to vector<16x1xf32>
    %53 = arith.subf %45, %28 : vector<16x1xf32>
    %54 = arith.subf %52, %28 : vector<16x1xf32>
    %55 = tpu.iota {dimensions = array<i32: 1>} : vector<16x128xi32>
    %c0_i32 = arith.constant 0 : i32
    %56 = vector.broadcast %c0_i32 : i32 to vector<16x128xi32>
    %57 = arith.cmpi eq, %55, %56 : vector<16x128xi32>
    %c1_i32 = arith.constant 1 : i32
    %58 = vector.broadcast %c1_i32 : i32 to vector<16x128xi32>
    %59 = arith.cmpi eq, %55, %58 : vector<16x128xi32>
    %c2_i32 = arith.constant 2 : i32
    %60 = vector.broadcast %c2_i32 : i32 to vector<16x128xi32>
    %61 = arith.cmpi eq, %55, %60 : vector<16x128xi32>
    %62 = arith.sitofp %39 : vector<16x1xi32> to vector<16x1xf32>
    %cst_27 = arith.constant 0.000000e+00 : f32
    %63 = vector.shape_cast %62 : vector<16x1xf32> to vector<16x1xf32>
    %64 = vector.broadcast %63 : vector<16x1xf32> to vector<16x128xf32>
    %65 = vector.broadcast %cst_27 : f32 to vector<16x128xf32>
    %66 = arith.select %61, %64, %65 : vector<16x128xi1>, vector<16x128xf32>
    %67 = vector.shape_cast %53 : vector<16x1xf32> to vector<16x1xf32>
    %68 = vector.broadcast %67 : vector<16x1xf32> to vector<16x128xf32>
    %69 = arith.select %59, %68, %66 : vector<16x128xi1>, vector<16x128xf32>
    %70 = vector.shape_cast %54 : vector<16x1xf32> to vector<16x1xf32>
    %71 = vector.broadcast %70 : vector<16x1xf32> to vector<16x128xf32>
    %72 = arith.select %57, %71, %69 : vector<16x128xi1>, vector<16x128xf32>
    %c0_28 = arith.constant 0 : index
    %c0_29 = arith.constant 0 : index
    %73 = vector.load %arg10[%c0_28, %c0_29] : memref<16x128xf32, #tpu.memory_space<vmem>>, vector<16x128xf32>
    tpu.vector_store %arg10[%c0_28, %c0_29], %72 {strides = array<i32>} : memref<16x128xf32, #tpu.memory_space<vmem>>, vector<16x128xf32>,
    return
  }
  func.func @transform_0(%arg0: i32) -> (i32, i32) {
    %c0_i32 = arith.constant 0 : i32
    %c0_i32_0 = arith.constant 0 : i32
    return %arg0, %c0_i32 : i32, i32
  }
  func.func @transform_1(%arg0: i32) -> (i32, i32) {
    %c0_i32 = arith.constant 0 : i32
    %c0_i32_0 = arith.constant 0 : i32
    return %arg0, %c0_i32 : i32, i32
  }
  func.func @transform_2(%arg0: i32) -> (i32, i32) {
    %c0_i32 = arith.constant 0 : i32
    %c0_i32_0 = arith.constant 0 : i32
    return %arg0, %c0_i32 : i32, i32
  }
  func.func @transform_3(%arg0: i32) -> (i32, i32) {
    %c0_i32 = arith.constant 0 : i32
    %c0_i32_0 = arith.constant 0 : i32
    %c0_i32_1 = arith.constant 0 : i32
    return %c0_i32, %c0_i32_0 : i32, i32
  }
  func.func @transform_4(%arg0: i32) -> (i32, i32) {
    %c0_i32 = arith.constant 0 : i32
    %c0_i32_0 = arith.constant 0 : i32
    %c0_i32_1 = arith.constant 0 : i32
    return %c0_i32, %c0_i32_0 : i32, i32
  }
  func.func @transform_5(%arg0: i32) -> (i32, i32) {
    %c0_i32 = arith.constant 0 : i32
    %c0_i32_0 = arith.constant 0 : i32
    %c0_i32_1 = arith.constant 0 : i32
    return %c0_i32, %c0_i32_0 : i32, i32
  }
  func.func @transform_6(%arg0: i32) -> (i32, i32) {
    %c0_i32 = arith.constant 0 : i32
    %c0_i32_0 = arith.constant 0 : i32
    %c0_i32_1 = arith.constant 0 : i32
    return %c0_i32, %c0_i32_0 : i32, i32
  }
  func.func @transform_7(%arg0: i32) -> (i32, i32) {
    %c0_i32 = arith.constant 0 : i32
    %c0_i32_0 = arith.constant 0 : i32
    %c0_i32_1 = arith.constant 0 : i32
    return %c0_i32, %c0_i32_0 : i32, i32
  }
  func.func @transform_8(%arg0: i32) -> (i32, i32) {
    %c0_i32 = arith.constant 0 : i32
    %c0_i32_0 = arith.constant 0 : i32
    %c0_i32_1 = arith.constant 0 : i32
    return %c0_i32, %c0_i32_0 : i32, i32
  }
  func.func @transform_9(%arg0: i32) -> (i32, i32) {
    %c0_i32 = arith.constant 0 : i32
    %c0_i32_0 = arith.constant 0 : i32
    return %arg0, %c0_i32 : i32, i32
  }
}

</mosaic_0001>

<bundles_post_ra>
// kernel: tpu_custom_call.1
= control target key start
LH: loop header
LB: loop body
LE: loop exit
PB: predicated region body
PF: predicated region fallthrough
CT: control target
= control target key end

     0   :  { %14 = vsyncpa [#allocation3], 0  ;;  %s1329_s0 = inlined_call_operand.vmem [shape: bf16[32,32], index: 0, kind: input, shape index: {}]   ;;  %s1330_s1 = inlined_call_operand.vmem [shape: f32[32,8], index: 1, kind: input, shape index: {}]   ;;  %s1331_s2 = inlined_call_operand.vmem [shape: s32[32,1], index: 2, kind: input, shape index: {}]   ;;  %s1332_s3 = inlined_call_operand.vmem [shape: bf16[32,64], index: 3, kind: input, shape index: {}]   ;;  %s1333_s4 = inlined_call_operand.vmem [shape: f32[1,64], index: 4, kind: input, shape index: {}]   ;;  %s1334_s5 = inlined_call_operand.vmem [shape: bf16[64,64], index: 5, kind: input, shape index: {}]   ;;  %s1335_s6 = inlined_call_operand.vmem [shape: f32[1,64], index: 6, kind: input, shape index: {}]   ;;  %s1336_s7 = inlined_call_operand.vmem [shape: bf16[64,8], index: 7, kind: input, shape index: {}]   ;;  %s1337_s8 = inlined_call_operand.vmem [shape: f32[1,8], index: 8, kind: input, shape index: {}]   ;;  %s1338_s9 = inlined_call_operand.hbm [shape: f32[32,128], index: 9, kind: output, shape index: {}]  }
   0x1   :  { %16 = vsyncpa [#allocation3 + $0x1], 0  ;;  %s1115_s30 = smov 0   ;;  %s1117_s10 = smov 0  }
   0x2   :  { %s1119_s11 = smov 0   ;;  %s1121_s12 = smov 0  }
   0x3 LB: > { %s1136_s13 = sadd.s32 4294967295, %s1057_s12   ;;  %s843_s14 = sadd.s32 4294967294, %s1057_s12   ;;  %s1057_s12 = sphi %s1121_s12, %s1344_s12   ;;  %s1053_s11 = sphi %s1119_s11, %s1343_s11   ;;  %s1049_s10 = sphi %s1117_s10, %s1342_s10   ;;  %s1045_s30 = sphi %s1115_s30, %s1341_s30  }
   0x4   : > { %s1140_s15 = sadd.s32 1, %s1057_s12   ;;  %s233_s16 = sadd.s32 1, %s1053_s11 }
   0x5   : > { %s230_s17 = ssub.s32 %s1057_s12, %s1140_s15  ;;  %p243_p0 = scmp.ne.s32.totalorder %s1053_s11, %s1049_s10 }
   0x6   : > { %p231_p1 = scmp.eq.s32.totalorder %s230_s17, 0  ;;  %p244_p2 = scmp.eq.s32.totalorder %s1136_s13, 1 }
   0x7   : > { %p249_p3 = scmp.ne.s32.totalorder %s1049_s10, %s1045_s30  ;;  %p250_p4 = scmp.eq.s32.totalorder %s843_s14, 1 }
   0x8   : > { %s1151_s18 = scalar_select %p231_p1, %s1053_s11, %s233_s16  }
   0x9   : > { %p1153_p5 = por %p244_p2, %p243_p0  ;;  %p1157_p6 = por %p250_p4, %p249_p3 }
   0xa   : > { %p846_p7 = scmp.ge.s32.totalorder %s1057_s12, 1  ;;  %p313_p8 = scmp.lt.s32.totalorder %s1057_s12, 3 }
   0xc   : > { %p314_p9 = pnand %p846_p7, %p313_p8 }
   0xd   : > { %v968_v0 = vld [vmem:[%s1332_s3] sm:$0xff] (!%p314_p9)   ;;  %v1059_v1 = vmov (!%p314_p9), 0.0   ;;  %v969_v2 = vld [vmem:[%s1332_s3 + $0x8] sm:$0xff] (!%p314_p9)   ;;  %vm1060_vm0 = vmmov (!%p314_p9), 0   ;;  %s848_s25 = sshll.u32 (!%p314_p9), %s1136_s13, 1  ;;  %vm409_vm1 = vcmask (!%p314_p9), 261120   ;;  %v662_v46 = vlaneseq (!%p314_p9) }
   0xe   : > { %317 = sbr.rel (%p314_p9) target bundleno = 1318 (0x526), region = 56  ;;  %890 = vmatprep.subr.bf16.mxu0 (!%p314_p9), %v1059_v1  ;;  %898 = vmatprep.subr.bf16.mxu1 (!%p314_p9), %v1059_v1  ;;  %p360_p10 = scmp.lt.s32.totalorder (!%p314_p9), %s848_s25, 3  ;;  %v971_v4 = vld [vmem:[%s1334_s5] sm:$0xff] (!%p314_p9)   ;;  %v972_v5 = vld [vmem:[%s1334_s5 + $0x8] sm:$0xff] (!%p314_p9)   ;;  %v973_v6 = vld [vmem:[%s1334_s5 + $0x10] sm:$0xff] (!%p314_p9)   ;;  %vm496_vm2 = vcmask (!%p314_p9), 523264  }
   0xf   : > { %891 = vmatpush3.bf16.msra.mxu0 (!%p314_p9), %v968_v0  ;;  %894 = vmatprep.mubr.msk.bf16.mxu0 (!%p314_p9), %vm1060_vm0, %v1059_v1  ;;  %v974_v7 = vld [vmem:[%s1334_s5 + $0x18] sm:$0xff] (!%p314_p9)   ;;  %v854_v8 = vld [vmem:[%s1333_s4] ss:$0 sm:$0xff] (!%p314_p9)  ;;  %v976_v19 = vld [vmem:[%s1336_s7 + $0x8] sm:$0xff] (!%p314_p9)   ;;  %vm627_vm3 = vcmask (!%p314_p9), 64512   ;;  %v1227_v47 = vand.u32 (!%p314_p9), 127, %v662_v46 }
  0x10   : > { %892 = vmatprep.subr.bf16.mxu0 (!%p314_p9), %v1059_v1  ;;  %906 = vmatprep.mubr.msk.bf16.mxu1 (!%p314_p9), %vm1060_vm0, %v1059_v1  ;;  %v975_v18 = vld [vmem:[%s1336_s7] sm:$0xff] (!%p314_p9)   ;;  %v977_v20 = vld [vmem:[%s1336_s7 + $0x10] sm:$0xff] (!%p314_p9)   ;;  %v978_v21 = vld [vmem:[%s1336_s7 + $0x18] sm:$0xff] (!%p314_p9)   ;;  %v1061_v59 = vmov (!%p314_p9), 0   ;;  %s1062_s22 = smov (!%p314_p9), [#allocation2]  }
  0x11   : > { %899 = vmatpush3.bf16.msra.mxu1 (!%p314_p9), %v971_v4  ;;  %v859_v22 = vld [vmem:[%s1335_s6] ss:$0 sm:$0xff] (!%p314_p9)  ;;  %967 = vset.pattern.permute.xlu1 (!%p314_p9), %v1061_v59  ;;  %vm732_vm12 = vcmp.eq.s32.totalorder (!%p314_p9), %v1227_v47, 2  ;;  %vm731_vm13 = vcmp.eq.s32.totalorder (!%p314_p9), %v1227_v47, 1  ;;  %vm730_vm14 = vcmp.eq.s32.totalorder (!%p314_p9), %v1227_v47, 0  ;;  %s999_s23 = sshll.u32 (!%p314_p9), %s1062_s22, 4  ;;  %s1000_s23 = int_to_ptr.vmem [resolvable:$false] %s999_s23 }
  0x12   : > { %900 = vmatprep.subr.bf16.mxu1 (!%p314_p9), %v1059_v1  ;;  %v865_v32 = vld [vmem:[%s1337_s8] ss:$0 sm:$0xff] (!%p314_p9)  ;;  %966 = vset.pattern.permute.xlu0 (!%p314_p9), %v1061_v59 }
  0x13   : > { %893 = vmatpush3.bf16.msra.mxu0 (!%p314_p9), %v969_v2 }
  0x14   : > { %910 = vmatprep.subr.bf16.mxu0 (!%p314_p9), %v1059_v1 }
  0x15   : > { %s1346_s25 = smov (!%p360_p10, %s848_s25), 3  ;;  %901 = vmatpush3.bf16.msra.mxu1 %v972_v5 }
  0x16   : > { %s849_s26 = sshll.u32 %s1346_s25, 2  ;;  %902 = vmatprep.subr.bf16.mxu1 %v1059_v1  ;;  %s851_s28 = sshll.u32 %s1346_s25, 3 }
  0x17   : > { %s363_s29 = scalar_lea.vmem %s1329_s0, %s849_s26  ;;  %s369_s16 = scalar_lea.vmem %s1330_s1, %s851_s28 }
  0x18   : > { %v970_v3 = vld [vmem:[%s363_s29] sm:$0xff]   ;;  %v653_v38 = vld [vmem:[%s369_s16 + $0x8] sm:$0xff]  ;;  %s375_s24 = scalar_lea.vmem %s1331_s2, %s851_s28  ;;  %s356_s25 = sand.u32 1, %s1049_s10  }
  0x19   : > { %895 = vmatmul.mubr.msk.bf16.vlgmr.msra.gmra.mrb[0].mxu0 %vm409_vm1, %v970_v3  ;;  %903 = vmatpush3.bf16.msra.mxu1 %v973_v6  ;;  %v652_v34 = vld [vmem:[%s369_s16] sm:$0xff]  ;;  %v709_v4 = vld [vmem:[%s375_s24 + $0x8] sm:$0xff]  ;;  %s847_s26 = sshll.u32 %s356_s25, 4  ;;  %s876_s28 = sshll.u32 %s1136_s13, 8 }
  0x1a   : > { %918 = vmatprep.mubr.msk.bf16.mxu0 %vm1060_vm0, %v1059_v1  ;;  %904 = vmatprep.subr.bf16.mxu1 %v1059_v1  ;;  %v708_v5 = vld [vmem:[%s375_s24] sm:$0xff]  ;;  %s358_s27 = scalar_lea.vmem [#allocation2], %s847_s26  ;;  %s1278_s17 = scalar_lea.hbm %s1338_s9, %s876_s28 }
  0x1b   : > { %911 = vmatpush3.bf16.msra.mxu0 %v975_v18  ;;  %s757_s29 = sshll.u32 %s358_s27, 4  ;;  %s1288_s13 = scalar_lea.sflag [#allocation3], %s356_s25  ;;  %s1280_s29 = int_to_ptr.vmem [resolvable:$true] %s757_s29 }
  0x1c   : > { %912 = vmatprep.subr.bf16.mxu0 %v1059_v1  ;;  %s995_s21 = scalar_lea.vmem %s1280_s29, 256  ;;  %s1001_s24 = scalar_lea.vmem %s1000_s23, 512 }
  0x1d   : > { %905 = vmatpush3.bf16.msra.mxu1 %v974_v7  ;;  %p996_p11 = scmp.ne.s32.totalorder %s1280_s29, %s995_s21  ;;  %p1002_p0 = scmp.lt.s32.totalorder %s1280_s29, %s1000_s23 }
  0x1e   : > { %p1003_p1 = scmp.lt.s32.totalorder %s1001_s24, %s995_s21 }
  0x1f   : > { %913 = vmatpush3.bf16.msra.mxu0 %v976_v19  ;;  %p997_p12 = pnand %p996_p11, %p1153_p5 }
  0x20   : > { %914 = vmatprep.subr.bf16.mxu0 %v1059_v1  ;;  %p1004_p2 = por %p1003_p1, %p1002_p0 }
  0x21   : > { %p998_p13 = pneg %p997_p12 }
  0x23   : > { %915 = vmatpush3.bf16.msra.mxu0 %v977_v20  ;;  %p1005_p3 = pnand %p1004_p2, %p998_p13 }
  0x24   : > { %916 = vmatprep.subr.bf16.mxu0 %v1059_v1 }
  0x27   : > { %917 = vmatpush3.bf16.msra.mxu0 %v978_v21 }
  0xec   : > { %v447_v9 = vpop.f32.mrb[0].mxu0 }
  0xed   : > { %v448_v10 = vadd.f32 %v854_v8, %v447_v9  ;;  %v896_v11 = vpop.f32.mrb[1].mxu0 }
  0xee   : > { %v450_v12 = vpop.f32.mrb[2].mxu0 }
  0xef   : > { %v451_v13 = vadd.f32 %v854_v8, %v450_v12  ;;  %v897_v14 = vpop.f32.mrb[3].mxu0  ;;  %979 = vtanh.f32 %v448_v10 }
  0xf1   : > { %981 = vtanh.f32 %v451_v13 }
  0xf9   : > { %v980_v15 = vpop.eup %979 }
  0xfb   : > { %v982_v16 = vpop.eup %981 }
  0xfc   : > { %v456_v17 = vpack.c.bf16 %v982_v16, %v980_v15 }
  0xfe   : > { %907 = vmatmul.mubr.msk.bf16.vlgmr.msra.gmra.mrb[0].mxu1 %vm496_vm2, %v456_v17 }
 0x1d1   : > { %v534_v23 = vpop.f32.mrb[0].mxu1 }
 0x1d2   : > { %v535_v24 = vadd.f32 %v859_v22, %v534_v23  ;;  %v908_v25 = vpop.f32.mrb[1].mxu1 }
 0x1d3   : > { %v537_v26 = vpop.f32.mrb[2].mxu1 }
 0x1d4   : > { %v538_v27 = vadd.f32 %v859_v22, %v537_v26  ;;  %v909_v28 = vpop.f32.mrb[3].mxu1  ;;  %983 = vtanh.f32 %v535_v24 }
 0x1d6   : > { %985 = vtanh.f32 %v538_v27 }
 0x1de   : > { %v984_v29 = vpop.eup %983 }
 0x1e0   : > { %v986_v30 = vpop.eup %985 }
 0x1e1   : > { %v543_v31 = vpack.c.bf16 %v986_v30, %v984_v29 }
 0x1e3   : > { %919 = vmatmul.mubr.msk.bf16.vlgmr.msra.gmra.mrb[4].mxu0 %vm496_vm2, %v543_v31 }
 0x2b6   : > { %v620_v33 = vpop.f32.mrb[4].mxu0 }
 0x2b7   : > { %v1217_v35 = vadd.f32 %v865_v32, %v620_v33  ;;  %v920_v36 = vpop.f32.mrb[5].mxu0 }
 0x2b8   : > { %v623_v37 = vpop.f32.mrb[6].mxu0 }
 0x2b9   : > { %v1219_v39 = vadd.f32 %v865_v32, %v623_v37  ;;  %v921_v40 = vpop.f32.mrb[7].mxu0  ;;  %v654_v41 = vadd.f32 %v652_v34, %v1217_v35  ;;  %v628_v45 = vsel %vm627_vm3, %v1217_v35, -inf }
 0x2bb   : > { %v656_v42 = vsel %vm627_vm3, %v654_v41, -inf  ;;  %v655_v43 = vadd.f32 %v653_v38, %v1219_v39  ;;  %v631_v58 = vsel %vm627_vm3, %v1219_v39, -inf }
 0x2bc   : > { %657 = vmax.xlane.f32.xlu0 %v656_v42 }
 0x2bd   : > { %v659_v44 = vsel %vm627_vm3, %v655_v43, -inf }
 0x2c0   : > { %660 = vmax.xlane.f32.xlu0 %v659_v44 }
 0x2c4   : > { %629 = vmax.xlane.f32.xlu0 %v628_v45 }
 0x349   : > { %v658_v48 = vpop.xlane.xlu0 %657 }
 0x34a   : > { %vm664_vm4 = vcmp.eq.f32.partialorder %v654_v41, %v658_v48 }
 0x34b   : > { %v666_v49 = vsel %vm664_vm4, %v1227_v47, 8 }
 0x34c   : > { %v668_v50 = vsel %vm627_vm3, %v666_v49, 2147483647 }
 0x34d   : > { %v661_v51 = vpop.xlane.xlu0 %660  ;;  %v670_v52 = vshra.s32 %v668_v50, 16  ;;  %v669_v60 = vand.u32 65535, %v668_v50 }
 0x34e   : > { %vm665_vm5 = vcmp.eq.f32.partialorder %v655_v43, %v661_v51 }
 0x34f   : > { %v667_v53 = vsel %vm665_vm5, %v1227_v47, 8  ;;  %v672_v54 = vcvt.s32.f32 %v670_v52  ;;  %v671_v62 = vcvt.s32.f32 %v669_v60 }
 0x350   : > { %v683_v55 = vsel %vm627_vm3, %v667_v53, 2147483647 }
 0x351   : > { %673 = vmin.xlane.f32.xlu1 %v672_v54  ;;  %v685_v56 = vshra.s32 %v683_v55, 16  ;;  %v684_v63 = vand.u32 65535, %v683_v55  ;;  %v630_v8 = vpop.xlane.xlu0 %629 }
 0x352   : > { %v634_v9 = vsub.f32 %v1217_v35, %v630_v8 }
 0x353   : > { %v687_v57 = vcvt.s32.f32 %v685_v56  ;;  %v686_v2 = vcvt.s32.f32 %v684_v63 }
 0x354   : > { %v636_v11 = vmul.f32 1.442695, %v634_v9 }
 0x355   : > { %688 = vmin.xlane.f32.xlu1 %v687_v57 }
 0x359   : > { %632 = vmax.xlane.f32.xlu1 %v631_v58 }
 0x3de   : > { %v674_v61 = vpop.xlane.xlu1 %673 }
 0x3df   : > { %vm675_vm6 = vcmp.eq.f32.partialorder %v672_v54, %v674_v61  ;;  %v680_v16 = vcvt.f32.s32 %v674_v61 }
 0x3e0   : > { %v676_v0 = vsel %vm675_vm6, %v671_v62, inf }
 0x3e1   : > { %677 = vmin.xlane.f32.xlu0 %v676_v0  ;;  %v681_v19 = vshll.u32 %v680_v16, 16 }
 0x3e2   : > { %v689_v1 = vpop.xlane.xlu1 %688 }
 0x3e3   : > { %vm690_vm7 = vcmp.eq.f32.partialorder %v687_v57, %v689_v1  ;;  %v695_v20 = vcvt.f32.s32 %v689_v1 }
 0x3e4   : > { %v691_v3 = vsel %vm690_vm7, %v686_v2, inf }
 0x3e5   : > { %692 = vmin.xlane.f32.xlu1 %v691_v3  ;;  %v696_v24 = vshll.u32 %v695_v20, 16 }
 0x3e6   : > { %v1240_v6 = vpop.xlane.xlu1 %632 }
 0x3e7   : > { %v635_v7 = vsub.f32 %v1219_v39, %v1240_v6 }
 0x3e9   : > { %v638_v10 = vmul.f32 1.442695, %v635_v7 }
 0x3eb   : > { %987 = vpow2.f32 %v638_v10 }
 0x3ec   : > { %989 = vpow2.f32 %v636_v11 }
 0x3f5   : > { %v988_v12 = vpop.eup %987 }
 0x3f6   : > { %714 = vperm.xlu1 %967, %v709_v4   ;;  %v643_v13 = vsel %vm627_vm3, %v988_v12, 0.0  ;;  %v990_v14 = vpop.eup %989 }
 0x3f7   : > { %711 = vperm.xlu0 %966, %v708_v5   ;;  %v640_v15 = vsel %vm627_vm3, %v990_v14, 0.0 }
 0x416   : > { %644 = vadd.xlane.f32.xlu0 %v643_v13 }
 0x41a   : > { %641 = vadd.xlane.f32.xlu1 %v640_v15 }
 0x46e   : > { %v678_v17 = vpop.xlane.xlu0 %677 }
 0x46f   : > { %v679_v18 = vcvt.f32.s32 %v678_v17 }
 0x471   : > { %v682_v22 = vadd.s32 %v681_v19, %v679_v18 }
 0x472   : > { %v693_v21 = vpop.xlane.xlu1 %692 }
 0x473   : > { %v694_v23 = vcvt.f32.s32 %v693_v21  ;;  %vm698_vm9 = vcmp.eq.s32.totalorder %v1227_v47, %v682_v22  ;;  %v733_v43 = vcvt.s32.f32 %v682_v22 }
 0x474   : > { %v700_v29 = vsel %vm698_vm9, %v1217_v35, 0.0 }
 0x475   : > { %v697_v26 = vadd.s32 %v696_v24, %v694_v23  ;;  %v702_v31 = vsel %vm627_vm3, %v700_v29, 0.0  ;;  %v735_v48 = vsel %vm732_vm12, %v733_v43, 0.0 }
 0x476   : > { %v712_v25 = vpop.permute.xlu0 %711  ;;  %v715_v30 = vpop.permute.xlu1 %714 }
 0x477   : > { %vm716_vm8 = vcmp.eq.s32.totalorder %v1227_v47, %v712_v25  ;;  %vm699_vm10 = vcmp.eq.s32.totalorder %v1227_v47, %v697_v26  ;;  %vm717_vm11 = vcmp.eq.s32.totalorder %v1227_v47, %v715_v30  ;;  %v734_v54 = vcvt.s32.f32 %v697_v26 }
 0x478   : > { %v718_v27 = vsel %vm716_vm8, %v1217_v35, 0.0  ;;  %v701_v32 = vsel %vm699_vm10, %v1219_v39, 0.0  ;;  %v719_v34 = vsel %vm717_vm11, %v1219_v39, 0.0 }
 0x479   : > { %v720_v28 = vsel %vm627_vm3, %v718_v27, 0.0  ;;  %v705_v33 = vsel %vm627_vm3, %v701_v32, 0.0  ;;  %v723_v36 = vsel %vm627_vm3, %v719_v34, 0.0  ;;  %v736_v57 = vsel %vm732_vm12, %v734_v54, 0.0 }
 0x47a   : > { %721 = vadd.xlane.f32.xlu1 %v720_v28 }
 0x47e   : > { %703 = vadd.xlane.f32.xlu1 %v702_v31 }
 0x482   : > { %706 = vadd.xlane.f32.xlu1 %v705_v33 }
 0x486   : > { %724 = vadd.xlane.f32.xlu1 %v723_v36 }
 0x4a3   : > { %v645_v37 = vpop.xlane.xlu0 %644 }
 0x4a7   : > { %v642_v35 = vpop.xlane.xlu1 %641 }
 0x4a8   : > { %991 = vlog2.f32 %v642_v35 }
 0x4a9   : > { %993 = vlog2.f32 %v645_v37 }
 0x4b2   : > { %v992_v38 = vpop.eup %991 }
 0x4b3   : > { %v647_v40 = vmul.f32 0.6931472, %v992_v38  ;;  %v994_v42 = vpop.eup %993 }
 0x4b4   : > { %v649_v39 = vmul.f32 0.6931472, %v994_v42 }
 0x4b5   : > { %v650_v44 = vadd.f32 %v647_v40, %v630_v8 }
 0x4b6   : > { %v651_v52 = vadd.f32 %v649_v39, %v1240_v6 }
 0x507   : > { %v722_v41 = vpop.xlane.xlu1 %721 }
 0x508   : > { %v728_v49 = vsub.f32 %v722_v41, %v650_v44 }
 0x50b   : > { %v704_v45 = vpop.xlane.xlu1 %703 }
 0x50c   : > { %v726_v46 = vsub.f32 %v704_v45, %v650_v44 }
 0x50e   : > { %v737_v50 = vsel %vm731_vm13, %v726_v46, %v735_v48 }
 0x50f   : > { %v739_v51 = vsel %vm730_vm14, %v728_v49, %v737_v50  ;;  %v707_v53 = vpop.xlane.xlu1 %706 }
 0x510   : > { %741 = vst [vmem:[%s358_s27] sm:$0xff] %v739_v51  ;;  %v727_v55 = vsub.f32 %v707_v53, %v651_v52 }
 0x512   : > { %v738_v59 = vsel %vm731_vm13, %v727_v55, %v736_v57 }
 0x513   : > { %v725_v56 = vpop.xlane.xlu1 %724 }
 0x514   : > { %v729_v58 = vsub.f32 %v725_v56, %v651_v52 }
 0x516   : > { %v740_v60 = vsel %vm730_vm14, %v729_v58, %v738_v59 }
 0x517   : > { %742 = vst [vmem:[%s358_s27 + $0x8] sm:$0xff] %v740_v60 }
 0x518   : > { %1008 = shalt.err (!%p1005_p3)
}
 0x519   : > { %s1009_s25 = scalar_lea.hbm %s1278_s17, 256  ;;  %s1013_s28 = scalar_lea.hbm %s1338_s9, 512 }
 0x51a   : > { %p1010_p4 = scmp.ne.s32.totalorder %s1278_s17, %s1009_s25  ;;  %p1014_p9 = scmp.lt.u32.totalorder %s1278_s17, %s1338_s9 }
 0x51b   : > { %p1015_p10 = scmp.lt.u32.totalorder %s1013_s28, %s1009_s25  ;;  %p1017_p12 = scmp.lt.u32.totalorder %s1009_s25, %s1278_s17 }
 0x51c   : > { %p1011_p7 = pnand %p1010_p4, %p1153_p5 }
 0x51d   : > { %p1016_p11 = por %p1015_p10, %p1014_p9 }
 0x51e   : > { %p1012_p8 = pneg %p1011_p7 }
 0x51f   : > { %p1018_p13 = por %p1017_p12, %p1016_p11 }
 0x521   : > { %p1019_p0 = pnand %p1018_p13, %p1012_p8 }
 0x523   : > { %1022 = shalt.err (!%p1019_p0)
}
 0x524   : > { %s1063_s21 = smov 128   ;;  %s1064_s22 = smov 8  }
 0x525   : > { %922 = dma.vmem_to_hbm [thread:$0]  (%p1153_p5), %s1280_s29, 256, %s1278_s17, %s1288_s13, %s1063_s21, %s1063_s21, %s1064_s22  }
 0x526 PF: > { %p928_p1 = scmp.ge.s32.totalorder %s1057_s12, 2  ;;  %s772_s23 = sand.u32 1, %s1045_s30  }
 0x527   : > { %s773_s24 = scalar_lea.sflag [#allocation3], %s772_s23 }
 0x528   : > { %p925_p2 = pnand %p928_p1, %p1157_p6 }
 0x52a   : > { %1040 = dma.done.wait (!%p925_p2), %s773_s24, 256  }
 0x52b   : > { %1042 = vsyncadd (!%p925_p2), %s773_s24, 4294967040  ;;  %p19_p3 = scmp.ge.s32.totalorder %s1140_s15, 4   ;;  %s1341_s30 = smov %s1049_s10 }
 0x52c   : > { %s1342_s10 = smov %s1053_s11  ;;  %s1343_s11 = smov %s1151_s18 }
 0x52d   : > { %s1344_s12 = smov %s1140_s15  ;;  %21 = sbr.rel (!%p19_p3) target bundleno = 3 (0x3), region = 97 }
 0x534   :  { %778 = vsyncpa [#allocation3], 1 }
 0x535   :  { %780 = vsyncpa [#allocation3 + $0x1], 1 }

</bundles_post_ra>
